<compile_context>
chip_gen: v6e
topology: v6e:2x2x1
jax: 0.10.0
libtpu: 0.0.40
codegen_flags: <defaults>
</compile_context>

<pallas_src>
import functools
import inspect

import jax
import jax.numpy as jnp
from jax.experimental import pallas as pl
from jax.experimental.pallas import tpu as pltpu

BN_EPS = 1e-5


def _round_up(x, m):
    return ((x + m - 1) // m) * m


def _vmem_capacity_bytes():
    """Physical VMEM per TensorCore (128 MiB v5e/v6e, 64 MiB v7x); safe fallback."""
    try:
        info = pltpu.get_tpu_info()
        cap = int(getattr(info, "vmem_capacity_bytes", 0))
        if cap > 0:
            return cap
    except Exception:
        pass
    return 64 * 1024 * 1024


def _pick_ts(S, per_col_bytes, fixed_bytes, budget):
    """Largest spatial tile (columns) whose VMEM working set fits `budget` bytes."""
    if S <= 128:
        return S                      # full-dim last block dim: always legal, no masking
    s_cap = _round_up(S, 128)
    for cand in (16384, 8192, 4096, 2048, 1024, 512, 256, 128):
        if cand > s_cap:
            continue
        if fixed_bytes + per_col_bytes * cand <= budget:
            return cand
    return 128


def _x_block_spec(cin, ts, n_steps):
    """Streamed-x BlockSpec; 3-deep buffering when supported (per-step compute is tiny)."""
    kwargs = {}
    try:
        if (n_steps >= 3 and hasattr(pl, "Buffered")
                and "pipeline_mode" in inspect.signature(pl.BlockSpec).parameters):
            kwargs["pipeline_mode"] = pl.Buffered(3)
    except (TypeError, ValueError):
        pass
    return pl.BlockSpec((1, cin, ts), lambda n, j: (n, 0, j), **kwargs)


# -----------------------------------------------------------------------------
# Pass A: 1x1-conv matmul per spatial tile, emit per-tile channel sum / sum-sq.
# -----------------------------------------------------------------------------
def _stats_kernel(x_ref, w_ref, stats_ref, *, s_valid, ts, mask_cols):
    # x_ref: (1, Cin, ts)   w_ref: (Cout, Cin)   stats_ref: (1, 1, Cout, 2)
    y = jnp.dot(w_ref[...], x_ref[0], preferred_element_type=jnp.float32)   # (Cout, ts)
    if mask_cols:  # ragged last tile: zero out out-of-range columns before reducing
        valid = s_valid - pl.program_id(1) * ts
        col = jax.lax.broadcasted_iota(jnp.int32, y.shape, 1)
        y = jnp.where(col < valid, y, 0.0)
    stats_ref[0, 0, :, 0:1] = jnp.sum(y, axis=1, keepdims=True)              # (Cout, 1)
    stats_ref[0, 0, :, 1:2] = jnp.sum(y * y, axis=1, keepdims=True)          # (Cout, 1)


# -----------------------------------------------------------------------------
# Pass B: recompute matmul, fused BN affine (scale/shift) + ReLU epilogue.
# -----------------------------------------------------------------------------
def _apply_kernel(x_ref, w_ref, ss_ref, o_ref):
    # x_ref: (1, Cin, ts)   w_ref: (Cout, Cin)   ss_ref: (Cout, 2)   o_ref: (1, Cout, ts)
    y = jnp.dot(w_ref[...], x_ref[0], preferred_element_type=jnp.float32)   # (Cout, ts)
    scale = ss_ref[:, 0:1]                                                   # (Cout, 1)
    shift = ss_ref[:, 1:2]                                                   # (Cout, 1)
    o_ref[0] = jnp.maximum(y * scale + shift, 0.0).astype(o_ref.dtype)


def downsample(x, conv_w, conv_b, bn_gamma, bn_beta, *, matmul_dtype=None):
    """Forward of DownSample. x: (N, Cin, H, W) NCHW -> (N, Cout, ceil(H/2), ceil(W/2)).

    matmul_dtype: HBM storage dtype for x / W (e.g. jnp.bfloat16 to halve input
    bandwidth on v5e/v6e/v7x).  Stats, BN epilogue and the output stay float32-accurate.
    """
    del conv_b  # cancelled exactly by training-mode BN mean subtraction
    N, Cin, H, W = x.shape
    Cout = conv_w.shape[0]
    H2, W2 = (H + 1) // 2, (W + 1) // 2
    S = H2 * W2

    mdt = jnp.dtype(matmul_dtype) if matmul_dtype is not None else jnp.dtype(x.dtype)
    out_dtype = x.dtype
    f32 = jnp.float32

    # Stride-2 spatial gather (the only remaining XLA preprocessing; reshape is free).
    # TODO(synk): fuse this gather into the kernels via memory_space=pl.ANY + manual
    # strided DMAs (even-H rows through index_map, even-W select in-kernel) so the odd
    # rows/cols of x are never read from HBM.
    xs = x[:, :, ::2, ::2].reshape(N, Cin, S).astype(mdt)        # (N, Cin, S)
    w = conv_w.reshape(Cout, Cin).astype(mdt)                    # (Cout, Cin)

    xb = mdt.itemsize
    ob = jnp.dtype(out_dtype).itemsize
    w_bytes = Cout * Cin * xb

    cap = _vmem_capacity_bytes()                                  # per-generation sizing
    vmem_limit = min(int(cap * 0.75), 100 * 1024 * 1024)
    budget = int(cap * 0.45)

    # Size each pass against its own working set (the two pallas_calls never coexist).
    ts_a = _pick_ts(S, per_col_bytes=3 * Cin * xb,
                    fixed_bytes=w_bytes + 4 * Cout * 2 * 4, budget=budget)
    ts_b = _pick_ts(S, per_col_bytes=3 * Cin * xb + 2 * Cout * ob,
                    fixed_bytes=w_bytes + 2 * Cout * 2 * 4, budget=budget)
    nta = pl.cdiv(S, ts_a)
    ntb = pl.cdiv(S, ts_b)

    cparams = pltpu.CompilerParams(
        dimension_semantics=("parallel", "parallel"),
        vmem_limit_bytes=vmem_limit)

    flops = 2 * N * S * Cin * Cout
    xs_bytes = N * Cin * S * xb
    stats_bytes = N * nta * Cout * 2 * 4
    out_bytes = N * Cout * S * ob

    # ---- Pass A: stats only (y is never written to HBM) ------------------------------
    stats = pl.pallas_call(
        functools.partial(_stats_kernel, s_valid=S, ts=ts_a, mask_cols=(S % ts_a) != 0),
        out_shape=jax.ShapeDtypeStruct((N, nta, Cout, 2), f32),
        grid=(N, nta),
        in_specs=[
            _x_block_spec(Cin, ts_a, N * nta),
            pl.BlockSpec((Cout, Cin), lambda n, j: (0, 0)),
        ],
        out_specs=pl.BlockSpec((1, 1, Cout, 2), lambda n, j: (n, j, 0, 0)),
        compiler_params=cparams,
        cost_estimate=pl.CostEstimate(
            flops=int(flops), transcendentals=0,
            bytes_accessed=int(xs_bytes + w_bytes + stats_bytes)),
    )(xs, w)

    # ---- Tiny cross-tile reduction + BN affine folding (f32, on-host-graph) ----------
    count = N * S
    sums = jnp.sum(stats, axis=(0, 1))                            # (Cout, 2)
    mean = sums[:, 0] / count
    # NOTE: single-pass E[y^2]-E[y]^2 (clamped >= 0); switch to a Welford-style per-tile
    # combine if tighter agreement with two-pass variance is ever required.
    var = jnp.maximum(sums[:, 1] / count - mean * mean, 0.0)
    scale = bn_gamma.astype(f32) * jax.lax.rsqrt(var + BN_EPS)
    shift = bn_beta.astype(f32) - mean * scale
    ss = jnp.stack([scale, shift], axis=1)                        # (Cout, 2)

    # ---- Pass B: recompute matmul + fused scale/shift + ReLU -------------------------
    out = pl.pallas_call(
        _apply_kernel,
        out_shape=jax.ShapeDtypeStruct((N, Cout, S), out_dtype),
        grid=(N, ntb),
        in_specs=[
            _x_block_spec(Cin, ts_b, N * ntb),
            pl.BlockSpec((Cout, Cin), lambda n, j: (0, 0)),
            pl.BlockSpec((Cout, 2), lambda n, j: (0, 0)),
        ],
        out_specs=pl.BlockSpec((1, Cout, ts_b), lambda n, j: (n, 0, j)),
        compiler_params=cparams,
        cost_estimate=pl.CostEstimate(
            flops=int(flops), transcendentals=0,
            bytes_accessed=int(xs_bytes + w_bytes + out_bytes)),
    )(xs, w, ss)

    # Channels-first throughout -> no output transpose; reshape is free.
    return out.reshape(N, Cout, H2, W2)


def reference(x, conv_w, conv_b, bn_gamma, bn_beta):
    """Pure-JAX reference of the PyTorch forward (training-mode BN)."""
    Cout, Cin = conv_w.shape[0], conv_w.shape[1]
    xs = x[:, :, ::2, ::2]
    y = jnp.einsum("nchw,oc->nohw", xs, conv_w.reshape(Cout, Cin)) \
        + conv_b.reshape(1, Cout, 1, 1)
    mean = jnp.mean(y, axis=(0, 2, 3), keepdims=True)
    var = jnp.mean((y - mean) ** 2, axis=(0, 2, 3), keepdims=True)
    yhat = (y - mean) * jax.lax.rsqrt(var + BN_EPS)
    out = yhat * bn_gamma.reshape(1, Cout, 1, 1) + bn_beta.reshape(1, Cout, 1, 1)
    return jnp.maximum(out, 0.0)


if __name__ == "__main__":
    key = jax.random.PRNGKey(0)
    k1, k2, k3, k4, k5 = jax.random.split(key, 5)

    N, in_c, out_c, H, W = 2, 4, 8, 16, 16
    x = jax.random.normal(k1, (N, in_c, H, W), dtype=jnp.float32)

    fan_in = in_c  # 1x1 kernel
    bound = 1.0 / (fan_in ** 0.5)
    conv_w = jax.random.uniform(k2, (out_c, in_c, 1, 1), jnp.float32, -bound, bound)
    conv_b = jax.random.uniform(k3, (out_c,), jnp.float32, -bound, bound)
    bn_gamma = jnp.ones((out_c,), jnp.float32) + 0.1 * jax.random.normal(k4, (out_c,))
    bn_beta = 0.1 * jax.random.normal(k5, (out_c,))

    ref = reference(x, conv_w, conv_b, bn_gamma, bn_beta)

    # f32 storage path: matches the PyTorch (f32) module tightly.
    out = jax.block_until_ready(downsample(x, conv_w, conv_b, bn_gamma, bn_beta))
    assert out.shape == (N, out_c, H // 2, W // 2), out.shape
    assert jnp.allclose(out, ref, atol=1e-4, rtol=1e-4), \
        float(jnp.max(jnp.abs(out - ref)))

    # bf16-at-HBM fast path (halves input bandwidth); looser tolerance.
    out_bf = jax.block_until_ready(
        downsample(x, conv_w, conv_b, bn_gamma, bn_beta, matmul_dtype=jnp.bfloat16))
    assert jnp.allclose(out_bf.astype(jnp.float32), ref, atol=5e-2, rtol=5e-2), \
        float(jnp.max(jnp.abs(out_bf.astype(jnp.float32) - ref)))

    print("KERNEL_OK")
</pallas_src>

<mosaic_0001>
module attributes {stable_mosaic.version = 11 : i64} {
  func.func @_stats_kernel(%arg0: i32, %arg1: i32, %arg2: memref<1x4x64xf32, #tpu.memory_space<vmem>>, %arg3: memref<8x4xf32, #tpu.memory_space<vmem>>, %arg4: memref<1x1x8x2xf32, #tpu.memory_space<vmem>>) attributes {dimension_semantics = [#tpu.dimension_semantics<parallel>, #tpu.dimension_semantics<parallel>], iteration_bounds = array<i64: 2, 1>, scalar_prefetch = 0 : i64, scratch_operands = 0 : i64, tpu.core_type = #tpu.core_type<tc>, window_params = [{transform_indices = @transform_0, window_bounds = array<i64: 1, 4, 64>}, {pipeline_mode = #tpu.pipeline_mode<synchronous>, transform_indices = @transform_1, window_bounds = array<i64: 8, 4>}, {transform_indices = @transform_2, window_bounds = array<i64: 1, 1, 8, 2>}]} {
    %c0 = arith.constant 0 : index
    %c0_0 = arith.constant 0 : index
    %0 = vector.load %arg3[%c0, %c0_0] : memref<8x4xf32, #tpu.memory_space<vmem>>, vector<8x4xf32>
    %c0_1 = arith.constant 0 : index
    %c0_2 = arith.constant 0 : index
    %c0_3 = arith.constant 0 : index
    %1 = vector.load %arg2[%c0_1, %c0_2, %c0_3] : memref<1x4x64xf32, #tpu.memory_space<vmem>>, vector<1x4x64xf32>
    %2 = vector.shape_cast %1 : vector<1x4x64xf32> to vector<4x64xf32>
    %cst = arith.constant dense<0.000000e+00> : vector<8x64xf32>
    %3 = tpu.matmul %0, %2, %cst {dimension_numbers = #tpu.dot_dimension_numbers<[1], [0], [0], [1], [0, 0, 1, 1], [], []>} : vector<8x4xf32>, vector<4x64xf32>, vector<8x64xf32> -> vector<8x64xf32>
    %cst_4 = arith.constant dense<0.000000e+00> : vector<8xf32>
    %4 = vector.multi_reduction <add>, %3, %cst_4 [1] : vector<8x64xf32> to vector<8xf32>
    %5 = vector.shape_cast %4 : vector<8xf32> to vector<8x1xf32>
    %c0_5 = arith.constant 0 : index
    %c0_6 = arith.constant 0 : index
    %c0_7 = arith.constant 0 : index
    %c0_8 = arith.constant 0 : index
    %6 = vector.load %arg4[%c0_5, %c0_6, %c0_7, %c0_8] : memref<1x1x8x2xf32, #tpu.memory_space<vmem>>, vector<1x1x8x1xf32>
    %7 = vector.shape_cast %6 : vector<1x1x8x1xf32> to vector<8x1xf32>
    %8 = vector.shape_cast %5 : vector<8x1xf32> to vector<1x1x8x1xf32>
    tpu.vector_store %arg4[%c0_5, %c0_6, %c0_7, %c0_8], %8 {strides = array<i32>} : memref<1x1x8x2xf32, #tpu.memory_space<vmem>>, vector<1x1x8x1xf32>,
    %9 = arith.mulf %3, %3 : vector<8x64xf32>
    %cst_9 = arith.constant dense<0.000000e+00> : vector<8xf32>
    %10 = vector.multi_reduction <add>, %9, %cst_9 [1] : vector<8x64xf32> to vector<8xf32>
    %11 = vector.shape_cast %10 : vector<8xf32> to vector<8x1xf32>
    %c0_10 = arith.constant 0 : index
    %c0_11 = arith.constant 0 : index
    %c0_12 = arith.constant 0 : index
    %c1 = arith.constant 1 : index
    %12 = vector.load %arg4[%c0_10, %c0_11, %c0_12, %c1] : memref<1x1x8x2xf32, #tpu.memory_space<vmem>>, vector<1x1x8x1xf32>
    %13 = vector.shape_cast %12 : vector<1x1x8x1xf32> to vector<8x1xf32>
    %14 = vector.shape_cast %11 : vector<8x1xf32> to vector<1x1x8x1xf32>
    tpu.vector_store %arg4[%c0_10, %c0_11, %c0_12, %c1], %14 {strides = array<i32>} : memref<1x1x8x2xf32, #tpu.memory_space<vmem>>, vector<1x1x8x1xf32>,
    return
  }
  func.func @transform_0(%arg0: i32, %arg1: i32) -> (i32, i32, i32) {
    %c0_i32 = arith.constant 0 : i32
    %c0_i32_0 = arith.constant 0 : i32
    return %arg0, %c0_i32, %arg1 : i32, i32, i32
  }
  func.func @transform_1(%arg0: i32, %arg1: i32) -> (i32, i32) {
    %c0_i32 = arith.constant 0 : i32
    %c0_i32_0 = arith.constant 0 : i32
    %c0_i32_1 = arith.constant 0 : i32
    return %c0_i32, %c0_i32_0 : i32, i32
  }
  func.func @transform_2(%arg0: i32, %arg1: i32) -> (i32, i32, i32, i32) {
    %c0_i32 = arith.constant 0 : i32
    %c0_i32_0 = arith.constant 0 : i32
    %c0_i32_1 = arith.constant 0 : i32
    return %arg0, %arg1, %c0_i32, %c0_i32_0 : i32, i32, i32, i32
  }
}

</mosaic_0001>

<bundles_post_ra>
// kernel: tpu_custom_call.1
= control target key start
LH: loop header
LB: loop body
LE: loop exit
PB: predicated region body
PF: predicated region fallthrough
CT: control target
= control target key end

     0   :  { %s421_s9 = smov 0   ;;  %s423_s10 = smov 0   ;;  %s457_s0 = inlined_call_operand.vmem [shape: f32[2,4,64], index: 0, kind: input, shape index: {}]   ;;  %s458_s1 = inlined_call_operand.vmem [shape: f32[8,4], index: 1, kind: input, shape index: {}]   ;;  %s459_s2 = inlined_call_operand.vmem [shape: f32[2,1,8,2], index: 2, kind: output, shape index: {}]  }
   0x1   :  { %s425_s11 = smov 0  }
   0x2 LB: > { %s24_s12 = sadd.s32 1, %s398_s10  ;;  %p340_p0 = scmp.ge.s32.totalorder %s402_s11, 1  ;;  %s402_s11 = sphi %s425_s11, %s12_s11   ;;  %s398_s10 = sphi %s423_s10, %s461_s10   ;;  %s394_s9 = sphi %s421_s9, %s460_s9  }
   0x3   : > { %p26_p1 = scmp.ge.s32.totalorder %s24_s12, 2  ;;  %p130_p2 = scmp.lt.s32.totalorder %s402_s11, 3 }
   0x5   : > { %s463_s12 = smov (%p26_p1, %s24_s12), 0  ;;  %p131_p3 = pnand %p340_p0, %p130_p2 }
   0x6   : > { %p156_p4 = scmp.lt.s32.totalorder (!%p131_p3), %s394_s9, 1 }
   0x7   : > { %134 = sbr.rel (%p131_p3) target bundleno = 354 (0x162), region = 28 }
   0xc   : > { %v404_v0 = vmov 0.0   ;;  %vm405_vm0 = vmmov 0   ;;  %s465_s9 = smov (!%p156_p4, %s394_s9), 1  ;;  %vm176_vm1 = vcmask 1043456   ;;  %v170_v1 = vld [vmem:[%s458_s1] sm:$0xff]  ;;  %vm172_vm2 = vcmask 31744  }
   0xd   : > { %349 = vmatprep.subr.mxu0 %v404_v0  ;;  %351 = vmatprep.mubr.msk.f32.mxu0 %vm405_vm0, %v404_v0  ;;  %s341_s13 = sshll.u32 %s465_s9, 2  ;;  %vm250_vm3 = vcmask 523264   ;;  %s342_s19 = sshll.u32 %s465_s9, 3  ;;  %vm254_vm4 = vcmask 7168   ;;  %vm260_vm5 = vcmask 15368  }
   0xe   : > { %s162_s16 = scalar_lea.vmem %s457_s0, %s341_s13  ;;  %s169_s22 = scalar_lea.vmem %s459_s2, %s342_s19 }
   0xf   : > { %v171_v2 = vld [vmem:[%s162_s16] sm:$0xf] }
  0x10   : > { %350 = vmatpush3.msk.msra.mxu0 %vm176_vm1, %v171_v2 }
  0x11   : > { %352 = vmatmul.mubr.msk.f32.vlgmr.msra.gmra.mxu0 %vm172_vm2, %v170_v1 }
  0xd1   : > { %v246_v3 = vpop.f32.mrf.mxu0 }
  0xd2   : > { %v256_v4 = vmul.f32 %v246_v3, %v246_v3  ;;  %v251_v5 = vsel %vm250_vm3, %v246_v3, 0.0 }
  0xd3   : > { %252 = vadd.xlane.f32.xlu0 %v251_v5  ;;  %v353_v6 = vpop.f32.mrf.mxu0 }
  0xd4   : > { %v257_v7 = vsel %vm250_vm3, %v256_v4, 0.0 }
  0xd7   : > { %258 = vadd.xlane.f32.xlu0 %v257_v7 }
 0x15c   : > { %v253_v8 = vpop.xlane.xlu0 %252 }
 0x15d   : > { %255 = vst.msk [vmem:[%s169_s22] sm:$0xff] %vm254_vm4, %v253_v8 }
 0x160   : > { %v259_v9 = vpop.xlane.xlu0 %258 }
 0x161   : > { %261 = vst.msk [vmem:[%s169_s22] sm:$0xff] %vm260_vm5, %v259_v9 }
 0x162 PF: > { %s12_s11 = sadd.s32 1, %s402_s11   ;;  %s460_s9 = smov %s398_s10 }
 0x163   : > { %p9_p5 = scmp.ge.s32.totalorder %s12_s11, 4   ;;  %s461_s10 = smov %s463_s12 }
 0x165   :  { %11 = sbr.rel (!%p9_p5) target bundleno = 2 (0x2), region = 58 }

</bundles_post_ra>
